<compile_context>
chip_gen: v5e
topology: v5e:2x2
jax: 0.10.0
libtpu: 0.0.40
codegen_flags: <defaults>
</compile_context>

<pallas_src>
import functools
from typing import List, Optional, Union

import jax
import jax.numpy as jnp
from jax import lax
from jax.experimental import pallas as pl
from jax.experimental.pallas import tpu as pltpu


def _round_up(x: int, m: int) -> int:
    return ((x + m - 1) // m) * m


def _global_pool_kernel(batch_ref, x_ref, *out_refs, need_sum: bool,
                        need_max: bool, g_chunk: int):
    """Segment add/max pooling over one (node-tile, feature-tile) block.

    batch_ref: (TN, 1) int32 graph id per node (padded nodes carry id == G_pad)
    x_ref:     (TN, TF) node features (input dtype, e.g. f32/bf16)
    out_refs:  sum_ref (G_pad, TF) f32 if need_sum, then max_ref (G_pad, TF) f32
               if need_max.  Both are resident accumulators across the node axis.
    """
    ni = pl.program_id(1)                     # node-tile index (reduction axis)
    tn = x_ref.shape[0]

    refs = list(out_refs)
    sum_ref = refs.pop(0) if need_sum else None
    max_ref = refs.pop(0) if need_max else None
    g_total = (sum_ref if sum_ref is not None else max_ref).shape[0]

    @pl.when(ni == 0)
    def _init():
        if need_sum:
            sum_ref[...] = jnp.zeros_like(sum_ref)
        if need_max:
            max_ref[...] = jnp.full_like(max_ref, -jnp.inf)

    b = batch_ref[...]                        # (TN, 1) int32
    x = x_ref[...]                            # (TN, TF), input dtype

    if need_sum:
        # global_add_pool: (G_pad, TF) += onehot^T @ x  (MXU, f32 accumulate)
        gid = lax.broadcasted_iota(jnp.int32, (tn, g_total), 1)   # (TN, G_pad)
        onehot = (gid == b).astype(x.dtype)                       # (TN, G_pad)
        sum_ref[...] += lax.dot_general(
            onehot, x, (((0,), (0,)), ((), ())),
            preferred_element_type=jnp.float32)

    if need_max:
        # global_max_pool: masked running max, chunked over graphs so the live
        # intermediate is (g_chunk, TN, TF) instead of (G_pad, TN, TF).
        xf = x.astype(jnp.float32)
        for g0 in range(0, g_total, g_chunk):                     # static chunks
            gid3 = lax.broadcasted_iota(jnp.int32, (g_chunk, tn, 1), 0) + g0
            mask3 = gid3 == b[None, :, :]                         # (gc, TN, 1)
            masked = jnp.where(mask3, xf[None, :, :], -jnp.inf)   # (gc, TN, TF)
            chunk_max = jnp.max(masked, axis=1)                   # (gc, TF)
            max_ref[g0:g0 + g_chunk, :] = jnp.maximum(
                max_ref[g0:g0 + g_chunk, :], chunk_max)


@functools.partial(
    jax.jit,
    static_argnames=("size", "need_sum", "need_mean", "need_max",
                     "tile_n", "tile_f"))
def _pooled_stats(x, batch, size: int, need_sum: bool, need_mean: bool,
                  need_max: bool, tile_n: Optional[int] = None,
                  tile_f: Optional[int] = None):
    """Returns (add_pool, mean_pool, max_pool); entries are None if unrequested."""
    N, F = x.shape
    G = int(size)

    kern_sum = need_sum or need_mean          # mean needs the segment sum
    kern_max = need_max

    # Tile sizing: bigger tiles when the VPU-heavy max path is absent.
    if tile_n is None:
        tile_n = 256 if kern_max else 1024
    if tile_f is None:
        tile_f = 256 if kern_max else 512

    g_pad = _round_up(max(G, 1), 8)           # sublane-aligned output rows
    f_pad = _round_up(F, 128)                 # lane-dense output columns
    tf = min(tile_f, f_pad)
    f_pad = _round_up(f_pad, tf)
    tn = min(tile_n, _round_up(N, 8))
    n_pad = _round_up(N, tn)

    # Pad nodes/features; padded nodes carry graph id == g_pad -> contribute to
    # no graph in either the onehot matmul or the max mask.
    x_p = x
    if (n_pad != N) or (f_pad != F):
        x_p = jnp.pad(x, ((0, n_pad - N), (0, f_pad - F)))
    batch_i = batch.astype(jnp.int32)
    batch_p = batch_i
    if n_pad != N:
        batch_p = jnp.pad(batch_i, (0, n_pad - N), constant_values=g_pad)
    batch2d = batch_p.reshape(n_pad, 1)

    grid = (f_pad // tf, n_pad // tn)         # (parallel F tiles, reduction node tiles)

    out_shapes = []
    out_specs = []
    if kern_sum:
        out_shapes.append(jax.ShapeDtypeStruct((g_pad, f_pad), jnp.float32))
        out_specs.append(pl.BlockSpec((g_pad, tf), lambda fi, ni: (0, fi)))
    if kern_max:
        out_shapes.append(jax.ShapeDtypeStruct((g_pad, f_pad), jnp.float32))
        out_specs.append(pl.BlockSpec((g_pad, tf), lambda fi, ni: (0, fi)))

    kernel = functools.partial(
        _global_pool_kernel,
        need_sum=kern_sum, need_max=kern_max, g_chunk=min(8, g_pad))

    outs = pl.pallas_call(
        kernel,
        out_shape=tuple(out_shapes),
        grid_spec=pltpu.PrefetchScalarGridSpec(
            num_scalar_prefetch=0,
            grid=grid,
            in_specs=[
                pl.BlockSpec((tn, 1), lambda fi, ni: (ni, 0)),    # batch ids
                pl.BlockSpec((tn, tf), lambda fi, ni: (ni, fi)),  # node features
            ],
            out_specs=out_specs,
        ),
        compiler_params=pltpu.CompilerParams(
            dimension_semantics=("parallel", "arbitrary"),
            vmem_limit_bytes=64 * 1024 * 1024),
    )(batch2d, x_p)

    if not isinstance(outs, (list, tuple)):
        outs = [outs]
    outs = list(outs)

    sums_f = outs.pop(0)[:G, :F] if kern_sum else None
    maxs_f = outs.pop(0)[:G, :F] if kern_max else None

    # Per-graph node counts: O(N) scatter-add on the id vector (plain-JAX glue).
    counts = None
    if need_mean or kern_max:
        counts = jnp.zeros((G, 1), jnp.float32).at[batch_i].add(1.0)

    sums = sums_f if need_sum else None
    means = (sums_f / jnp.maximum(counts, 1.0)) if need_mean else None
    maxs = None
    if kern_max:
        # Empty graphs: match scatter-max semantics (0) instead of -inf.
        maxs = jnp.where(counts > 0, maxs_f, 0.0)
    return sums, means, maxs


class GlobalPooling:
    """JAX/Pallas equivalent of torch_geometric GlobalPooling (add/mean/max)."""

    def __init__(self, aggr: Union[str, List[str]]):
        self.aggrs = [aggr] if isinstance(aggr, str) else list(aggr)
        assert len(self.aggrs) > 0
        assert len(set(self.aggrs) | {"sum", "add", "mean", "max"}) == 4

    def __call__(self, x, batch: Optional[jnp.ndarray], size: Optional[int] = None):
        N = x.shape[0]
        if batch is None:
            batch = jnp.zeros((N,), dtype=jnp.int32)
            size = 1 if size is None else size
        if size is None:
            # size must be static for the kernel; prefer passing it explicitly —
            # this forces a device->host sync and fails on traced inputs.
            size = int(jnp.max(batch)) + 1
        size = int(size)

        need_sum = any(a in ("add", "sum") for a in self.aggrs)
        need_mean = "mean" in self.aggrs
        need_max = "max" in self.aggrs

        sums, means, maxs = _pooled_stats(x, batch, size, need_sum, need_mean,
                                          need_max)

        parts = []
        for aggr in self.aggrs:
            if aggr in ("sum", "add"):
                parts.append(sums)
            elif aggr == "mean":
                parts.append(means)
            elif aggr == "max":
                parts.append(maxs)
        out = parts[0] if len(parts) == 1 else jnp.concatenate(parts, axis=-1)
        return out.astype(x.dtype)


if __name__ == "__main__":
    key = jax.random.PRNGKey(0)
    N, F, G = 16, 32, 3
    x = jax.random.normal(key, (N, F), dtype=jnp.float32)
    # Deterministic batch assignment covering every graph (PyG-style sorted ids).
    batch = jnp.array([0] * 5 + [1] * 6 + [2] * 5, dtype=jnp.int32)

    # Pure-JAX reference (segment ops).
    seg_sum = jax.ops.segment_sum(x, batch, num_segments=G)
    cnt = jax.ops.segment_sum(jnp.ones((N, 1), jnp.float32), batch, num_segments=G)
    seg_mean = seg_sum / jnp.maximum(cnt, 1.0)
    seg_max = jax.ops.segment_max(x, batch, num_segments=G)
    ref = jnp.concatenate([seg_sum, seg_mean, seg_max], axis=-1)

    # All three aggregations concatenated.
    module = GlobalPooling(["add", "mean", "max"])
    out = jax.block_until_ready(module(x, batch, size=G))
    assert out.shape == (G, 3 * F), out.shape
    assert jnp.allclose(out, ref, atol=1e-5, rtol=1e-5), "kernel/reference mismatch"

    # Specialized paths (sum-only kernel, max-only kernel).
    out_add = jax.block_until_ready(GlobalPooling("add")(x, batch, size=G))
    assert jnp.allclose(out_add, seg_sum, atol=1e-5, rtol=1e-5), "add-only mismatch"
    out_max = jax.block_until_ready(GlobalPooling("max")(x, batch, size=G))
    assert jnp.allclose(out_max, seg_max, atol=1e-5, rtol=1e-5), "max-only mismatch"

    print("KERNEL_OK")
</pallas_src>

<mosaic_0001>
module attributes {stable_mosaic.version = 11 : i64} {
  func.func @_global_pool_kernel(%arg0: i32, %arg1: i32, %arg2: memref<16x1xi32, #tpu.memory_space<vmem>>, %arg3: memref<16x128xf32, #tpu.memory_space<vmem>>, %arg4: memref<8x128xf32, #tpu.memory_space<vmem>>, %arg5: memref<8x128xf32, #tpu.memory_space<vmem>>) attributes {dimension_semantics = [#tpu.dimension_semantics<parallel>, #tpu.dimension_semantics<arbitrary>], iteration_bounds = array<i64: 1, 1>, scalar_prefetch = 0 : i64, scratch_operands = 0 : i64, tpu.core_type = #tpu.core_type<tc>, window_params = [{transform_indices = @transform_0, window_bounds = array<i64: 16, 1>}, {transform_indices = @transform_1, window_bounds = array<i64: 16, 128>}, {transform_indices = @transform_2, window_bounds = array<i64: 8, 128>}, {transform_indices = @transform_3, window_bounds = array<i64: 8, 128>}]} {
    %c0_i32 = arith.constant 0 : i32
    %0 = arith.cmpi eq, %arg1, %c0_i32 : i32
    %1 = arith.extui %0 : i1 to i32
    %c0_i32_0 = arith.constant 0 : i32
    %2 = arith.cmpi ne, %1, %c0_i32_0 : i32
    scf.if %2 {
      %cst_15 = arith.constant 0.000000e+00 : f32
      %31 = vector.broadcast %cst_15 : f32 to vector<8x128xf32>
      %c0_16 = arith.constant 0 : index
      %c0_17 = arith.constant 0 : index
      %32 = vector.load %arg4[%c0_16, %c0_17] : memref<8x128xf32, #tpu.memory_space<vmem>>, vector<8x128xf32>
      tpu.vector_store %arg4[%c0_16, %c0_17], %31 {strides = array<i32>} : memref<8x128xf32, #tpu.memory_space<vmem>>, vector<8x128xf32>,
      %cst_18 = arith.constant 0xFF800000 : f32
      %33 = vector.broadcast %cst_18 : f32 to vector<8x128xf32>
      %c0_19 = arith.constant 0 : index
      %c0_20 = arith.constant 0 : index
      %34 = vector.load %arg5[%c0_19, %c0_20] : memref<8x128xf32, #tpu.memory_space<vmem>>, vector<8x128xf32>
      tpu.vector_store %arg5[%c0_19, %c0_20], %33 {strides = array<i32>} : memref<8x128xf32, #tpu.memory_space<vmem>>, vector<8x128xf32>,
    } else {
    }
    %c0 = arith.constant 0 : index
    %c0_1 = arith.constant 0 : index
    %3 = vector.load %arg2[%c0, %c0_1] : memref<16x1xi32, #tpu.memory_space<vmem>>, vector<16x1xi32>
    %c0_2 = arith.constant 0 : index
    %c0_3 = arith.constant 0 : index
    %4 = vector.load %arg3[%c0_2, %c0_3] : memref<16x128xf32, #tpu.memory_space<vmem>>, vector<16x128xf32>
    %5 = tpu.iota {dimensions = array<i32: 1>} : vector<16x8xi32>
    %6 = vector.broadcast %3 : vector<16x1xi32> to vector<16x8xi32>
    %7 = arith.cmpi eq, %5, %6 : vector<16x8xi32>
    %8 = arith.extui %7 : vector<16x8xi1> to vector<16x8xi32>
    %9 = arith.sitofp %8 : vector<16x8xi32> to vector<16x8xf32>
    %c0_4 = arith.constant 0 : index
    %c0_5 = arith.constant 0 : index
    %10 = vector.load %arg4[%c0_4, %c0_5] : memref<8x128xf32, #tpu.memory_space<vmem>>, vector<8x128xf32>
    %cst = arith.constant dense<0.000000e+00> : vector<8x128xf32>
    %11 = tpu.matmul %9, %4, %cst {dimension_numbers = #tpu.dot_dimension_numbers<[0], [0], [1], [1], [0, 1, 1, 1], [], []>} : vector<16x8xf32>, vector<16x128xf32>, vector<8x128xf32> -> vector<8x128xf32>
    %12 = arith.addf %10, %11 : vector<8x128xf32>
    %c0_6 = arith.constant 0 : index
    %c0_7 = arith.constant 0 : index
    %13 = vector.load %arg4[%c0_6, %c0_7] : memref<8x128xf32, #tpu.memory_space<vmem>>, vector<8x128xf32>
    tpu.vector_store %arg4[%c0_6, %c0_7], %12 {strides = array<i32>} : memref<8x128xf32, #tpu.memory_space<vmem>>, vector<8x128xf32>,
    %14 = tpu.iota {dimensions = array<i32: 0>} : vector<8x16x1xi32>
    %c0_i32_8 = arith.constant 0 : i32
    %15 = vector.broadcast %c0_i32_8 : i32 to vector<8x16x1xi32>
    %16 = arith.addi %14, %15 : vector<8x16x1xi32>
    %17 = vector.shape_cast %3 : vector<16x1xi32> to vector<1x16x1xi32>
    %18 = vector.broadcast %17 : vector<1x16x1xi32> to vector<8x16x1xi32>
    %19 = arith.cmpi eq, %16, %18 : vector<8x16x1xi32>
    %20 = vector.shape_cast %4 : vector<16x128xf32> to vector<1x16x128xf32>
    %cst_9 = arith.constant 0xFF800000 : f32
    %21 = vector.shape_cast %19 : vector<8x16x1xi1> to vector<8x16x1xi1>
    %22 = vector.broadcast %21 : vector<8x16x1xi1> to vector<8x16x128xi1>
    %23 = vector.shape_cast %20 : vector<1x16x128xf32> to vector<1x16x128xf32>
    %24 = vector.broadcast %23 : vector<1x16x128xf32> to vector<8x16x128xf32>
    %25 = vector.broadcast %cst_9 : f32 to vector<8x16x128xf32>
    %26 = arith.select %22, %24, %25 : vector<8x16x128xi1>, vector<8x16x128xf32>
    %cst_10 = arith.constant dense<0xFF800000> : vector<8x128xf32>
    %27 = vector.multi_reduction <maximumf>, %26, %cst_10 [1] : vector<8x16x128xf32> to vector<8x128xf32>
    %c0_11 = arith.constant 0 : index
    %c0_12 = arith.constant 0 : index
    %28 = vector.load %arg5[%c0_11, %c0_12] : memref<8x128xf32, #tpu.memory_space<vmem>>, vector<8x128xf32>
    %29 = arith.maximumf %28, %27 : vector<8x128xf32>
    %c0_13 = arith.constant 0 : index
    %c0_14 = arith.constant 0 : index
    %30 = vector.load %arg5[%c0_13, %c0_14] : memref<8x128xf32, #tpu.memory_space<vmem>>, vector<8x128xf32>
    tpu.vector_store %arg5[%c0_13, %c0_14], %29 {strides = array<i32>} : memref<8x128xf32, #tpu.memory_space<vmem>>, vector<8x128xf32>,
    return
  }
  func.func @transform_0(%arg0: i32, %arg1: i32) -> (i32, i32) {
    %c0_i32 = arith.constant 0 : i32
    %c0_i32_0 = arith.constant 0 : i32
    return %arg1, %c0_i32 : i32, i32
  }
  func.func @transform_1(%arg0: i32, %arg1: i32) -> (i32, i32) {
    %c0_i32 = arith.constant 0 : i32
    return %arg1, %arg0 : i32, i32
  }
  func.func @transform_2(%arg0: i32, %arg1: i32) -> (i32, i32) {
    %c0_i32 = arith.constant 0 : i32
    %c0_i32_0 = arith.constant 0 : i32
    return %c0_i32, %arg0 : i32, i32
  }
  func.func @transform_3(%arg0: i32, %arg1: i32) -> (i32, i32) {
    %c0_i32 = arith.constant 0 : i32
    %c0_i32_0 = arith.constant 0 : i32
    return %c0_i32, %arg0 : i32, i32
  }
}

</mosaic_0001>

<bundles_post_ra>
// kernel: _pooled_stats.1
= control target key start
LH: loop header
LB: loop body
LE: loop exit
PB: predicated region body
PF: predicated region fallthrough
CT: control target
= control target key end

     0   :  { %v307_v0 = vmov 0   ;;  %v23_v20 = vlaneseq  ;;  %v308_v23 = vmov 0.0   ;;  %s402_s0 = inlined_call_operand.vmem [shape: s32[16,1], index: 0, kind: input, shape index: {}]   ;;  %s403_s1 = inlined_call_operand.vmem [shape: f32[16,128], index: 1, kind: input, shape index: {}]   ;;  %s404_s3 = inlined_call_operand.vmem [shape: f32[8,128], index: 3, kind: output, shape index: {1}]   ;;  %s405_s2 = inlined_call_operand.vmem [shape: f32[8,128], index: 2, kind: output, shape index: {0}]  }
   0x1   :  { %304 = vset.pattern.permute.xlu0 %v307_v0  ;;  %v19_v1 = vld [vmem:[%s402_s0] sm:$0xff]  ;;  %305 = vset.pattern.permute.xlu2 %v307_v0  ;;  %v338_v3 = vld [vmem:[%s402_s0 + $0x8] sm:$0xff] }
   0x2   :  { %26 = vperm.xlu0 %304, %v19_v1   ;;  %vm96_vm0 = vcmp.eq.s32.totalorder %v19_v1, 0  ;;  %vm97_vm1 = vcmp.eq.s32.totalorder %v338_v3, 0  ;;  %vm98_vm2 = vcmp.eq.s32.totalorder %v19_v1, 1  ;;  %vm100_vm3 = vcmp.eq.s32.totalorder %v19_v1, 2  ;;  %v365_v18 = vld [vmem:[%s403_s1 + $0x8] sm:$0xff]  ;;  %v371_v19 = vld [vmem:[%s403_s1] sm:$0xff] }
   0x3   :  { %v112_v2 = vsel %vm96_vm0, 1, %v307_v0  ;;  %v113_v4 = vsel %vm97_vm1, 1, %v307_v0  ;;  %v114_v5 = vsel %vm98_vm2, 1, %v307_v0  ;;  %v116_v6 = vsel %vm100_vm3, 1, %v307_v0  ;;  %88 = vmatpush.msra.mxu0 %v365_v18 }
   0x4   :  { %129 = vperm.xlu2 %305, %v112_v2   ;;  %vm101_vm4 = vcmp.eq.s32.totalorder %v338_v3, 2  ;;  %vm102_vm5 = vcmp.eq.s32.totalorder %v19_v1, 3  ;;  %vm103_vm6 = vcmp.eq.s32.totalorder %v338_v3, 3  ;;  %vm104_vm7 = vcmp.eq.s32.totalorder %v19_v1, 4 }
   0x5   :  { %v117_v7 = vsel %vm101_vm4, 1, %v307_v0  ;;  %v118_v8 = vsel %vm102_vm5, 1, %v307_v0  ;;  %v119_v9 = vsel %vm103_vm6, 1, %v307_v0  ;;  %v120_v10 = vsel %vm104_vm7, 1, %v307_v0  ;;  %89 = vmatpush.msra.mxu0 %v371_v19 }
   0x6   :  { %vm105_vm8 = vcmp.eq.s32.totalorder %v338_v3, 4  ;;  %vm106_vm9 = vcmp.eq.s32.totalorder %v19_v1, 5  ;;  %vm107_vm10 = vcmp.eq.s32.totalorder %v338_v3, 5  ;;  %vm108_vm11 = vcmp.eq.s32.totalorder %v19_v1, 6 }
   0x7   :  { %v121_v11 = vsel %vm105_vm8, 1, %v307_v0  ;;  %v122_v12 = vsel %vm106_vm9, 1, %v307_v0  ;;  %v123_v13 = vsel %vm107_vm10, 1, %v307_v0  ;;  %v124_v14 = vsel %vm108_vm11, 1, %v307_v0 }
   0x8   :  { %vm109_vm12 = vcmp.eq.s32.totalorder %v338_v3, 6  ;;  %vm110_vm13 = vcmp.eq.s32.totalorder %v19_v1, 7  ;;  %vm111_vm14 = vcmp.eq.s32.totalorder %v338_v3, 7  ;;  %v24_v21 = vand.u32 127, %v23_v20 }
   0x9   :  { %v125_v15 = vsel %vm109_vm12, 1, %v307_v0  ;;  %v126_v16 = vsel %vm110_vm13, 1, %v307_v0  ;;  %v127_v17 = vsel %vm111_vm14, 1, %v307_v0  ;;  %vm99_vm1 = vcmp.eq.s32.totalorder %v338_v3, 1 }
   0xa   :  { %29 = vperm.xlu0 %304, %v338_v3   ;;  %v115_v27 = vsel %vm99_vm1, 1, %v307_v0  ;;  %vm70_vm2 = vcmask 130048  }
   0xc   :  { %132 = vperm.xlu2 %305, %v113_v4  }
  0x12   :  { %135 = vperm.xlu0 %304, %v114_v5  }
  0x14   :  { %141 = vperm.xlu2 %305, %v116_v6  }
  0x1a   :  { %144 = vperm.xlu0 %304, %v117_v7  }
  0x1c   :  { %147 = vperm.xlu2 %305, %v118_v8  }
  0x22   :  { %150 = vperm.xlu0 %304, %v119_v9  }
  0x24   :  { %153 = vperm.xlu2 %305, %v120_v10  }
  0x2a   :  { %156 = vperm.xlu0 %304, %v121_v11  }
  0x2c   :  { %159 = vperm.xlu2 %305, %v122_v12  }
  0x32   :  { %162 = vperm.xlu0 %304, %v123_v13  }
  0x34   :  { %165 = vperm.xlu2 %305, %v124_v14  }
  0x3a   :  { %168 = vperm.xlu0 %304, %v125_v15  }
  0x3c   :  { %171 = vperm.xlu2 %305, %v126_v16  }
  0x42   :  { %174 = vperm.xlu0 %304, %v127_v17  }
  0x5e   :  { %v130_v28 = vpop.permute.xlu2 %129 }
  0x5f   :  { %vm176_vm3 = vcmp.eq.s32.totalorder %v130_v28, 1 }
  0x60   :  { %v192_v42 = vsel %vm176_vm3, %v371_v19, -inf  ;;  %vm273_vm3 = vcmask 1041409  }
  0x66   :  { %v133_v30 = vpop.permute.xlu2 %132 }
  0x67   :  { %vm177_vm4 = vcmp.eq.s32.totalorder %v133_v30, 1 }
  0x68   :  { %v193_v43 = vsel %vm177_vm4, %v365_v18, -inf  ;;  %vm275_vm4 = vcmask 1042434  }
  0x69   :  { %v208_v44 = vmax.f32 %v192_v42, %v193_v43 }
  0x6b   :  { %v209_v56 = vrot.slane %v208_v44, 4 }
  0x6d   :  { %v210_v2 = vmax.f32 %v208_v44, %v209_v56 }
  0x6e   :  { %v142_v32 = vpop.permute.xlu2 %141 }
  0x6f   :  { %vm180_vm6 = vcmp.eq.s32.totalorder %v142_v32, 1  ;;  %v211_v10 = vrot.slane %v210_v2, 2 }
  0x70   :  { %v196_v48 = vsel %vm180_vm6, %v371_v19, -inf  ;;  %vm279_vm6 = vcmask 1044484  }
  0x74   :  { %v27_v22 = vpop.permute.xlu0 %26 }
  0x75   :  { %vm31_vm15 = vcmp.eq.s32.totalorder %v24_v21, %v27_v22  ;;  %v212_v22 = vmax.f32 %v210_v2, %v211_v10 }
  0x76   :  { %v298_v24 = vsel %vm31_vm15, 1.0, %v308_v23  ;;  %v148_v34 = vpop.permute.xlu2 %147 }
  0x77   :  { %38 = vxpose.xlu1.b32.start [1/2] (short) (narrow) %v298_v24, 8  ;;  %vm182_vm8 = vcmp.eq.s32.totalorder %v148_v34, 1 }
  0x78   :  { %v198_v50 = vsel %vm182_vm8, %v371_v19, -inf  ;;  %vm283_vm8 = vcmask 1046534  }
  0x7c   :  { %v30_v25 = vpop.permute.xlu0 %29 }
  0x7d   :  { %vm32_vm0 = vcmp.eq.s32.totalorder %v24_v21, %v30_v25 }
  0x7e   :  { %v299_v26 = vsel %vm32_vm0, 1.0, %v308_v23  ;;  %v154_v37 = vpop.permute.xlu2 %153 }
  0x7f   :  { %39 = vxpose.xlu1.b32.end [2/2] (short) (narrow) %v299_v26, 8  ;;  %vm184_vm10 = vcmp.eq.s32.totalorder %v154_v37, 1 }
  0x80   :  { %v200_v52 = vsel %vm184_vm10, %v371_v19, -inf }
  0x84   :  { %v377_v29 = vpop.permute.xlu0 %135 }
  0x85   :  { %vm178_vm1 = vcmp.eq.s32.totalorder %v377_v29, 1 }
  0x86   :  { %v160_v39 = vpop.permute.xlu2 %159  ;;  %v194_v13 = vsel %vm178_vm1, %v371_v19, -inf }
  0x87   :  { %vm186_vm12 = vcmp.eq.s32.totalorder %v160_v39, 1 }
  0x88   :  { %v202_v55 = vsel %vm186_vm12, %v371_v19, -inf }
  0x8c   :  { %v145_v31 = vpop.permute.xlu0 %144 }
  0x8d   :  { %vm181_vm5 = vcmp.eq.s32.totalorder %v145_v31, 1  ;;  %v213_v31 = vrot.slane %v212_v22, 1 }
  0x8e   :  { %v166_v41 = vpop.permute.xlu2 %165  ;;  %v197_v47 = vsel %vm181_vm5, %v365_v18, -inf  ;;  %vm277_vm5 = vcmask 1043459  }
  0x8f   :  { %vm188_vm14 = vcmp.eq.s32.totalorder %v166_v41, 1  ;;  %v222_v53 = vmax.f32 %v196_v48, %v197_v47 }
  0x90   :  { %v204_v59 = vsel %vm188_vm14, %v371_v19, -inf }
  0x94   :  { %v151_v33 = vpop.permute.xlu0 %150 }
  0x95   :  { %vm183_vm7 = vcmp.eq.s32.totalorder %v151_v33, 1 }
  0x96   :  { %v172_v46 = vpop.permute.xlu2 %171  ;;  %v199_v49 = vsel %vm183_vm7, %v365_v18, -inf  ;;  %vm281_vm7 = vcmask 1045509  }
  0x97   :  { %vm190_vm0 = vcmp.eq.s32.totalorder %v172_v46, 1  ;;  %v229_v57 = vmax.f32 %v198_v50, %v199_v49 }
  0x98   :  { %v206_v62 = vsel %vm190_vm0, %v371_v19, -inf }
  0x99   :  { %v230_v3 = vrot.slane %v229_v57, 4 }
  0x9b   :  { %v231_v11 = vmax.f32 %v229_v57, %v230_v3 }
  0x9c   :  { %v157_v36 = vpop.permute.xlu0 %156 }
  0x9d   :  { %vm185_vm9 = vcmp.eq.s32.totalorder %v157_v36, 1  ;;  %v232_v23 = vrot.slane %v231_v11, 2 }
  0x9e   :  { %v201_v51 = vsel %vm185_vm9, %v365_v18, -inf  ;;  %vm285_vm9 = vcmask 1047559  }
  0x9f   :  { %v236_v60 = vmax.f32 %v200_v52, %v201_v51  ;;  %v233_v32 = vmax.f32 %v231_v11, %v232_v23 }
  0xa1   :  { %v237_v5 = vrot.slane %v236_v60, 4  ;;  %v234_v39 = vrot.slane %v233_v32, 1 }
  0xa3   :  { %v238_v14 = vmax.f32 %v236_v60, %v237_v5  ;;  %v235_v47 = vmax.f32 %v233_v32, %v234_v39 }
  0xa4   :  { %v163_v38 = vpop.permute.xlu0 %162 }
  0xa5   :  { %vm187_vm11 = vcmp.eq.s32.totalorder %v163_v38, 1  ;;  %v239_v26 = vrot.slane %v238_v14, 2  ;;  %v214_v38 = vmax.f32 %v212_v22, %v213_v31 }
  0xa6   :  { %v203_v54 = vsel %vm187_vm11, %v365_v18, -inf }
  0xa7   :  { %v243_v63 = vmax.f32 %v202_v55, %v203_v54  ;;  %v240_v34 = vmax.f32 %v238_v14, %v239_v26 }
  0xa9   :  { %v244_v6 = vrot.slane %v243_v63, 4  ;;  %v241_v42 = vrot.slane %v240_v34, 1 }
  0xab   :  { %v245_v16 = vmax.f32 %v243_v63, %v244_v6  ;;  %v242_v50 = vmax.f32 %v240_v34, %v241_v42 }
  0xac   :  { %v169_v40 = vpop.permute.xlu0 %168 }
  0xad   :  { %vm189_vm13 = vcmp.eq.s32.totalorder %v169_v40, 1 }
  0xae   :  { %v205_v58 = vsel %vm189_vm13, %v365_v18, -inf }
  0xaf   :  { %v250_v1 = vmax.f32 %v204_v59, %v205_v58 }
  0xb1   :  { %v251_v8 = vrot.slane %v250_v1, 4 }
  0xb3   :  { %v252_v21 = vmax.f32 %v250_v1, %v251_v8 }
  0xb4   :  { %v175_v45 = vpop.permute.xlu0 %174 }
  0xb5   :  { %vm191_vm15 = vcmp.eq.s32.totalorder %v175_v45, 1  ;;  %v253_v30 = vrot.slane %v252_v21, 2 }
  0xb6   :  { %v207_v61 = vsel %vm191_vm15, %v365_v18, -inf }
  0xb7   :  { %v257_v4 = vmax.f32 %v206_v62, %v207_v61  ;;  %v254_v37 = vmax.f32 %v252_v21, %v253_v30 }
  0xb9   :  { %v258_v12 = vrot.slane %v257_v4, 4  ;;  %v255_v46 = vrot.slane %v254_v37, 1 }
  0xbb   :  { %v259_v24 = vmax.f32 %v257_v4, %v258_v12  ;;  %v256_v54 = vmax.f32 %v254_v37, %v255_v46 }
  0xbd   :  { %v260_v33 = vrot.slane %v259_v24, 2 }
  0xbf   :  { %v261_v40 = vmax.f32 %v259_v24, %v260_v33 }
  0xc1   :  { %v262_v48 = vrot.slane %v261_v40, 1 }
  0xc3   :  { %v263_v56 = vmax.f32 %v261_v40, %v262_v48 }
  0xd2   :  { %306 = vset.pattern.permute.xlu1 %v307_v0  ;;  %v223_v0 = vrot.slane %v222_v53, 4 }
  0xd4   :  { %v224_v7 = vmax.f32 %v222_v53, %v223_v0 }
  0xd6   :  { %v225_v20 = vrot.slane %v224_v7, 2 }
  0xd8   :  { %v226_v29 = vmax.f32 %v224_v7, %v225_v20 }
  0xd9   :  { %138 = vperm.xlu1 %306, %v115_v27   ;;  %v246_v27 = vrot.slane %v245_v16, 2 }
  0xda   :  { %v227_v36 = vrot.slane %v226_v29, 1 }
  0xdc   :  { %v228_v45 = vmax.f32 %v226_v29, %v227_v36 }
 0x11b   :  { %v54_v35 = vpop.trf.xlu1 }
 0x11c   :  { %300 = vmatmul.msk.f32.vlgmr.msra.gmra.mxu0 %vm70_vm2, %v54_v35  ;;  %v247_v35 = vmax.f32 %v245_v16, %v246_v27 }
 0x11e   :  { %v248_v43 = vrot.slane %v247_v35, 1 }
 0x120   :  { %v249_v52 = vmax.f32 %v247_v35, %v248_v43 }
 0x14b   :  { %v139_v9 = vpop.permute.xlu1 %138 }
 0x14c   :  { %vm179_vm2 = vcmp.eq.s32.totalorder %v139_v9, 1 }
 0x14d   :  { %v195_v15 = vsel %vm179_vm2, %v365_v18, -inf }
 0x14e   :  { %v215_v17 = vmax.f32 %v194_v13, %v195_v15 }
 0x150   :  { %v216_v25 = vrot.slane %v215_v17, 4 }
 0x152   :  { %v217_v28 = vmax.f32 %v215_v17, %v216_v25 }
 0x154   :  { %v218_v19 = vrot.slane %v217_v28, 2 }
 0x156   :  { %v219_v18 = vmax.f32 %v217_v28, %v218_v19 }
 0x158   :  { %v220_v41 = vrot.slane %v219_v18, 1 }
 0x15a   :  { %v221_v44 = vmax.f32 %v219_v18, %v220_v41 }
 0x15c   :  { %v274_v49 = vsel %vm273_vm3, %v221_v44, %v214_v38 }
 0x15d   :  { %v276_v51 = vsel %vm275_vm4, %v228_v45, %v274_v49 }
 0x15e   :  { %v278_v53 = vsel %vm277_vm5, %v235_v47, %v276_v51 }
 0x15f   :  { %v280_v55 = vsel %vm279_vm6, %v242_v50, %v278_v53 }
 0x160   :  { %v282_v57 = vsel %vm281_vm7, %v249_v52, %v280_v55 }
 0x161   :  { %v284_v58 = vsel %vm283_vm8, %v256_v54, %v282_v57 }
 0x162   :  { %v286_v59 = vsel %vm285_vm9, %v263_v56, %v284_v58 }
 0x163   :  { %289 = vst [vmem:[%s404_s3] sm:$0xff] %v286_v59 }
 0x199   :  { %v91_v60 = vpop.f32.mrf.mxu0 }
 0x19a   :  { %95 = vst [vmem:[%s405_s2] sm:$0xff] %v91_v60 }

</bundles_post_ra>
